<compile_context>
chip_gen: v7x
topology: tpu7x:2x2x1
jax: 0.10.0
libtpu: 0.0.40
codegen_flags: <defaults>
</compile_context>

<pallas_src>
import functools

import jax
import jax.numpy as jnp
from jax.experimental import pallas as pl
from jax.experimental.pallas import tpu as pltpu


def _round_up(v, m):
    return (v + m - 1) // m * m


def _pick_tile(size, max_tile, align):
    """Largest tile <= max_tile (aligned) that keeps per-axis padding small."""
    if size <= max_tile:
        return _round_up(size, align)
    ntiles = -(-size // max_tile)
    return _round_up(-(-size // ntiles), align)


def _hw_params():
    """Generation-conditional tiling / VMEM budget (safe fallback if unknown)."""
    try:
        vmem_bytes = pltpu.get_tpu_info().vmem_capacity_bytes
    except Exception:
        vmem_bytes = 64 * 1024 * 1024  # conservative (v7x-sized) fallback
    if vmem_bytes >= 100 * 1024 * 1024:
        # v4 / v5e / v5p / v6e: 128 MiB VMEM -> bigger tiles, fewer grid steps.
        return dict(to_max=256, ts_max=2048, tk_max=1024,
                    k_single_max=2048, vmem_limit=80 * 1024 * 1024)
    # v7x: 64 MiB VMEM per TC -> keep the double-buffered working set modest.
    return dict(to_max=256, ts_max=1024, tk_max=512,
                k_single_max=1024, vmem_limit=40 * 1024 * 1024)


def _apply_act(r, activation):
    if activation == "relu":
        return jnp.maximum(r, 0.0)
    if activation == "sigmoid":
        return jax.nn.sigmoid(r)
    if activation == "tanh":
        return jnp.tanh(r)
    return r


# ------------------------------ kernels --------------------------------------

def _conv_act_kernel_1k(w_ref, x_ref, b_ref, o_ref, *, activation):
    # Whole contraction in one block: no accumulator scratch, no init pass.
    # w_ref: (to, K) bf16   x_ref: (K, ts) bf16   b_ref: (to, 1) f32
    r = jnp.dot(w_ref[...], x_ref[...], preferred_element_type=jnp.float32)
    r = r + b_ref[...]                       # (to, 1) broadcasts over lanes
    o_ref[...] = _apply_act(r, activation).astype(o_ref.dtype)


def _conv_act_kernel_nk(w_ref, x_ref, b_ref, o_ref, acc_ref, *, activation):
    # Tiled contraction: f32 accumulator persists across K steps.
    k = pl.program_id(3)
    part = jnp.dot(w_ref[...], x_ref[...], preferred_element_type=jnp.float32)

    @pl.when(k == 0)
    def _():
        acc_ref[...] = part                  # direct assign (no zero-init pass)

    @pl.when(k > 0)
    def _():
        acc_ref[...] += part

    @pl.when(k == pl.num_programs(3) - 1)
    def _():
        r = acc_ref[...] + b_ref[...]
        o_ref[...] = _apply_act(r, activation).astype(o_ref.dtype)


# ------------------------------ im2col ---------------------------------------

def _build_cols(x, kh, kw, padding):
    """cols[n, c*kh*kw + ki*kw + kj, ho*Wo + wo] = xp[n, c, ho+ki, wo+kj].

    Transpose-free (channels already lead in NCHW): only strided slices, a
    stack along a new tap axis, and adjacent-dim reshapes.  For ksize=1 this
    is a free reshape (no HBM expansion at all).
    TODO(synk): fold the kh*kw tap gather into the kernel (shifted windows
    along the K reduction) to remove the kh*kw-fold HBM expansion for large
    feature maps.
    """
    n, c, h, w = x.shape
    p = padding
    xp = jnp.pad(x, ((0, 0), (0, 0), (p, p), (p, p))) if p > 0 else x
    ho = h + 2 * p - kh + 1
    wo = w + 2 * p - kw + 1
    if kh == 1 and kw == 1:
        return xp.reshape(n, c, ho * wo), ho, wo
    taps = []
    for ki in range(kh):
        for kj in range(kw):
            taps.append(xp[:, :, ki:ki + ho, kj:kj + wo])    # (N, C, Ho, Wo)
    cols = jnp.stack(taps, axis=2)                           # (N, C, kh*kw, Ho, Wo)
    cols = cols.reshape(n, c * kh * kw, ho * wo)             # adjacent merges only
    return cols, ho, wo


# ------------------------------ wrapper --------------------------------------

def conv2d_act(x, weight, bias, *, padding=0, activation="relu",
               compute_dtype=jnp.bfloat16):
    """x: [N,C,H,W], weight: [O,C,kh,kw], bias: [O] -> [N,O,Ho,Wo].

    Matches nn.Conv2d(stride=1, dilation=1, groups=1) + activation.
    """
    if activation not in ("relu", "sigmoid", "tanh"):
        raise ValueError(f"unsupported activation: {activation}")
    n, c, h, w = x.shape
    o, c2, kh, kw = weight.shape
    assert c == c2, "channel mismatch (groups != 1 not supported)"
    ho = h + 2 * padding - kh + 1
    wo = w + 2 * padding - kw + 1
    assert ho > 0 and wo > 0, "kernel larger than padded input"
    out_dtype = x.dtype

    hw = _hw_params()

    # bf16 operands (f32 accumulation in-kernel): cast BEFORE building cols so
    # the materialized cols stream is already half-width.
    xb = x.astype(compute_dtype)
    wb = weight.astype(compute_dtype)

    cols, ho, wo = _build_cols(xb, kh, kw, padding)          # (N, K, S)
    K = c * kh * kw
    S = ho * wo

    # ---- tiles: sublane dim O, lane dim S, contraction K --------------------
    if o <= hw["to_max"]:
        to = _round_up(o, 8)
        o_pad = to
    else:
        to = hw["to_max"]
        o_pad = _round_up(o, to)

    ts = _pick_tile(S, hw["ts_max"], 128)                    # lane-dense output
    s_pad = _round_up(S, ts)

    if K <= hw["k_single_max"]:
        tk, k_pad = K, K                                     # single K block
    else:
        tk = _pick_tile(K, hw["tk_max"], 256)
        k_pad = _round_up(K, tk)
    nk = k_pad // tk

    # ---- pad operands only when actually misaligned -------------------------
    w2d = wb.reshape(o, K)
    if (o_pad, k_pad) != (o, K):
        w2d = jnp.pad(w2d, ((0, o_pad - o), (0, k_pad - K)))
    b1 = bias.astype(jnp.float32)
    if o_pad != o:
        b1 = jnp.pad(b1, (0, o_pad - o))
    b2d = b1.reshape(o_pad, 1)
    if (k_pad, s_pad) != (K, S):
        # Only hit when shapes are misaligned; ksize=1 / 128-aligned S pay nothing.
        # TODO(synk): fold this into _build_cols (pad xp spatially) so cols is
        # never rewritten just for alignment.
        cols = jnp.pad(cols, ((0, 0), (0, k_pad - K), (0, s_pad - S)))

    # ---- grid: O-tiles outermost so the weight tile stays VMEM-resident -----
    if nk == 1:
        grid = (o_pad // to, n, s_pad // ts)
        in_specs = [
            pl.BlockSpec((to, tk), lambda oi, b, si: (oi, 0)),
            pl.BlockSpec((None, tk, ts), lambda oi, b, si: (b, 0, si)),
            pl.BlockSpec((to, 1), lambda oi, b, si: (oi, 0)),
        ]
        out_spec = pl.BlockSpec((None, to, ts), lambda oi, b, si: (b, oi, si))
        scratch = []
        kernel = functools.partial(_conv_act_kernel_1k, activation=activation)
        dims = ("parallel", "parallel", "parallel")
    else:
        grid = (o_pad // to, n, s_pad // ts, nk)
        in_specs = [
            pl.BlockSpec((to, tk), lambda oi, b, si, ki: (oi, ki)),
            pl.BlockSpec((None, tk, ts), lambda oi, b, si, ki: (b, ki, si)),
            pl.BlockSpec((to, 1), lambda oi, b, si, ki: (oi, 0)),
        ]
        out_spec = pl.BlockSpec((None, to, ts),
                                lambda oi, b, si, ki: (b, oi, si))
        scratch = [pltpu.VMEM((to, ts), jnp.float32)]
        kernel = functools.partial(_conv_act_kernel_nk, activation=activation)
        dims = ("parallel", "parallel", "parallel", "arbitrary")

    out = pl.pallas_call(
        kernel,
        out_shape=jax.ShapeDtypeStruct((n, o_pad, s_pad), out_dtype),
        grid_spec=pltpu.PrefetchScalarGridSpec(
            num_scalar_prefetch=0,
            grid=grid,
            in_specs=in_specs,
            out_specs=out_spec,
            scratch_shapes=scratch,
        ),
        compiler_params=pltpu.CompilerParams(
            dimension_semantics=dims,
            vmem_limit_bytes=hw["vmem_limit"],
        ),
    )(w2d, cols, b2d)

    out = out[:, :o, :S].reshape(n, o, ho, wo)   # drop padding; no transpose
    return out


def conv2d_act_ref(x, weight, bias, *, padding=0, activation="relu"):
    """Pure-JAX f32 reference (mirrors PyTorch Conv2d + activation)."""
    out = jax.lax.conv_general_dilated(
        x, weight, window_strides=(1, 1),
        padding=[(padding, padding), (padding, padding)],
        dimension_numbers=("NCHW", "OIHW", "NCHW"))
    out = out + bias.reshape(1, -1, 1, 1)
    return _apply_act(out, activation)


if __name__ == "__main__":
    key = jax.random.PRNGKey(0)
    kx, kw_, kb, kx2, kw2, kb2 = jax.random.split(key, 6)

    n, cin, cout, h, w = 2, 4, 8, 16, 16
    TOL = dict(atol=2e-2, rtol=2e-2)   # bf16 operands (f32 accumulation)

    # --- Config 1: module defaults (ksize=1, padding=0, relu) — fused 1x1 path
    x = jax.random.normal(kx, (n, cin, h, w), dtype=jnp.float32)
    fan_in = cin * 1 * 1
    bound = 1.0 / (fan_in ** 0.5)
    weight = jax.random.uniform(kw_, (cout, cin, 1, 1),
                                minval=-bound, maxval=bound, dtype=jnp.float32)
    bias = jax.random.uniform(kb, (cout,),
                              minval=-bound, maxval=bound, dtype=jnp.float32)

    out = conv2d_act(x, weight, bias, padding=0, activation="relu")
    out = jax.block_until_ready(out)
    ref = conv2d_act_ref(x, weight, bias, padding=0, activation="relu")
    assert out.shape == ref.shape == (n, cout, h, w)
    assert jnp.allclose(out, ref, **TOL)

    # --- Config 1b: same weights, sigmoid head --------------------------------
    out_s = conv2d_act(x, weight, bias, padding=0, activation="sigmoid")
    out_s = jax.block_until_ready(out_s)
    ref_s = conv2d_act_ref(x, weight, bias, padding=0, activation="sigmoid")
    assert jnp.allclose(out_s, ref_s, **TOL)

    # --- Config 2: 3x3 conv, padding=1, tanh — general-ksize path -------------
    k3 = 3
    fan_in = cin * k3 * k3
    bound = 1.0 / (fan_in ** 0.5)
    x3 = jax.random.normal(kx2, (n, cin, h, w), dtype=jnp.float32)
    w3 = jax.random.uniform(kw2, (cout, cin, k3, k3),
                            minval=-bound, maxval=bound, dtype=jnp.float32)
    b3 = jax.random.uniform(kb2, (cout,),
                            minval=-bound, maxval=bound, dtype=jnp.float32)

    out3 = conv2d_act(x3, w3, b3, padding=1, activation="tanh")
    out3 = jax.block_until_ready(out3)
    ref3 = conv2d_act_ref(x3, w3, b3, padding=1, activation="tanh")
    assert out3.shape == ref3.shape == (n, cout, h, w)
    assert jnp.allclose(out3, ref3, **TOL)

    print("KERNEL_OK")
</pallas_src>

<mosaic_0001>
module attributes {stable_mosaic.version = 11 : i64} {
  func.func @_conv_act_kernel_1k(%arg0: i32, %arg1: i32, %arg2: i32, %arg3: memref<8x4xbf16, #tpu.memory_space<vmem>>, %arg4: memref<1x4x256xbf16, #tpu.memory_space<vmem>>, %arg5: memref<8x1xf32, #tpu.memory_space<vmem>>, %arg6: memref<1x8x256xf32, #tpu.memory_space<vmem>>) attributes {dimension_semantics = [#tpu.dimension_semantics<parallel>, #tpu.dimension_semantics<parallel>, #tpu.dimension_semantics<parallel>], iteration_bounds = array<i64: 1, 2, 1>, scalar_prefetch = 0 : i64, scratch_operands = 0 : i64, tpu.core_type = #tpu.core_type<tc>, window_params = [{transform_indices = @transform_0, window_bounds = array<i64: 8, 4>}, {transform_indices = @transform_1, window_bounds = array<i64: 1, 4, 256>}, {transform_indices = @transform_2, window_bounds = array<i64: 8, 1>}, {transform_indices = @transform_3, window_bounds = array<i64: 1, 8, 256>}]} {
    %c0 = arith.constant 0 : index
    %c0_0 = arith.constant 0 : index
    %0 = vector.load %arg3[%c0, %c0_0] : memref<8x4xbf16, #tpu.memory_space<vmem>>, vector<8x4xbf16>
    %c0_1 = arith.constant 0 : index
    %c0_2 = arith.constant 0 : index
    %c0_3 = arith.constant 0 : index
    %1 = vector.load %arg4[%c0_1, %c0_2, %c0_3] : memref<1x4x256xbf16, #tpu.memory_space<vmem>>, vector<1x4x256xbf16>
    %2 = vector.shape_cast %1 : vector<1x4x256xbf16> to vector<4x256xbf16>
    %cst = arith.constant dense<0.000000e+00> : vector<8x256xf32>
    %3 = tpu.matmul %0, %2, %cst {dimension_numbers = #tpu.dot_dimension_numbers<[1], [0], [0], [1], [0, 0, 1, 1], [], []>} : vector<8x4xbf16>, vector<4x256xbf16>, vector<8x256xf32> -> vector<8x256xf32>
    %c0_4 = arith.constant 0 : index
    %c0_5 = arith.constant 0 : index
    %4 = vector.load %arg5[%c0_4, %c0_5] : memref<8x1xf32, #tpu.memory_space<vmem>>, vector<8x1xf32>
    %5 = vector.broadcast %4 : vector<8x1xf32> to vector<8x256xf32>
    %6 = arith.addf %3, %5 : vector<8x256xf32>
    %cst_6 = arith.constant 0.000000e+00 : f32
    %7 = vector.broadcast %cst_6 : f32 to vector<8x256xf32>
    %8 = arith.maximumf %6, %7 : vector<8x256xf32>
    %c0_7 = arith.constant 0 : index
    %c0_8 = arith.constant 0 : index
    %c0_9 = arith.constant 0 : index
    %9 = vector.load %arg6[%c0_7, %c0_8, %c0_9] : memref<1x8x256xf32, #tpu.memory_space<vmem>>, vector<1x8x256xf32>
    %10 = vector.shape_cast %9 : vector<1x8x256xf32> to vector<8x256xf32>
    %11 = vector.shape_cast %8 : vector<8x256xf32> to vector<1x8x256xf32>
    tpu.vector_store %arg6[%c0_7, %c0_8, %c0_9], %11 {strides = array<i32>} : memref<1x8x256xf32, #tpu.memory_space<vmem>>, vector<1x8x256xf32>,
    return
  }
  func.func @transform_0(%arg0: i32, %arg1: i32, %arg2: i32) -> (i32, i32) {
    %c0_i32 = arith.constant 0 : i32
    %c0_i32_0 = arith.constant 0 : i32
    return %arg0, %c0_i32 : i32, i32
  }
  func.func @transform_1(%arg0: i32, %arg1: i32, %arg2: i32) -> (i32, i32, i32) {
    %c0_i32 = arith.constant 0 : i32
    %c0_i32_0 = arith.constant 0 : i32
    return %arg1, %c0_i32, %arg2 : i32, i32, i32
  }
  func.func @transform_2(%arg0: i32, %arg1: i32, %arg2: i32) -> (i32, i32) {
    %c0_i32 = arith.constant 0 : i32
    %c0_i32_0 = arith.constant 0 : i32
    return %arg0, %c0_i32 : i32, i32
  }
  func.func @transform_3(%arg0: i32, %arg1: i32, %arg2: i32) -> (i32, i32, i32) {
    %c0_i32 = arith.constant 0 : i32
    return %arg1, %arg0, %arg2 : i32, i32, i32
  }
}

</mosaic_0001>

<bundles_post_ra>
// kernel: tpu_custom_call.1
= control target key start
LH: loop header
LB: loop body
LE: loop exit
PB: predicated region body
PF: predicated region fallthrough
CT: control target
= control target key end

     0   :  { %8 = vsyncpa [#allocation3], 0  ;;  %s744_s0 = inlined_call_operand.vmem [shape: bf16[8,4], index: 0, kind: input, shape index: {}]   ;;  %s745_s1 = inlined_call_operand.vmem [shape: bf16[2,4,256], index: 1, kind: input, shape index: {}]   ;;  %s746_s2 = inlined_call_operand.vmem [shape: f32[8,1], index: 2, kind: input, shape index: {}]   ;;  %s747_s3 = inlined_call_operand.hbm [shape: f32[2,8,256], index: 3, kind: output, shape index: {}]  }
   0x1   :  { %10 = vsyncpa [#allocation3 + $0x1], 0  ;;  %s626_s12 = smov 0   ;;  %s628_s13 = smov 0  }
   0x2   :  { %s630_s14 = smov 0   ;;  %s632_s15 = smov 0  }
   0x3   :  { %s634_s16 = smov 0   ;;  %s636_s17 = smov 0  }
   0x4 LB: > { %s447_s18 = sadd.s32 4294967295, %s602_s17   ;;  %s448_s19 = sadd.s32 4294967294, %s602_s17   ;;  %s602_s17 = sphi %s636_s17, %s16_s17   ;;  %s598_s16 = sphi %s634_s16, %s754_s16   ;;  %s594_s15 = sphi %s632_s15, %s753_s15   ;;  %s590_s14 = sphi %s630_s14, %s752_s14   ;;  %s586_s13 = sphi %s628_s13, %s751_s13   ;;  %s582_s12 = sphi %s626_s12, %s750_s12  }
   0x5   : > { %s31_s20 = sadd.s32 1, %s598_s16  ;;  %s126_s21 = sadd.s32 1, %s590_s14 }
   0x6   : > { %p33_p0 = scmp.ge.s32.totalorder %s31_s20, 2  ;;  %p136_p1 = scmp.ne.s32.totalorder %s590_s14, %s586_s13 }
   0x7   : > { %p137_p2 = scmp.eq.s32.totalorder %s447_s18, 1  ;;  %p142_p3 = scmp.ne.s32.totalorder %s586_s13, %s582_s12 }
   0x8   : > { %s756_s20 = smov (%p33_p0, %s31_s20), 0  ;;  %p143_p5 = scmp.eq.s32.totalorder %s448_s19, 1 }
   0x9   : > { %p666_p4 = por %p137_p2, %p136_p1  ;;  %s119_s23 = ssub.s32 %s598_s16, %s756_s20 }
   0xa   : > { %p453_p6 = scmp.ge.s32.totalorder %s602_s17, 1  ;;  %p124_p7 = scmp.eq.s32.totalorder %s119_s23, 0 }
   0xb   : > { %p673_p8 = por %p143_p5, %p142_p3  ;;  %p188_p9 = scmp.lt.s32.totalorder %s602_s17, 3 }
   0xc   : > { %s679_s25 = scalar_select %p124_p7, %s590_s14, %s126_s21  }
   0xd   : > { %p189_p10 = pnand %p453_p6, %p188_p9 }
   0xe   : > { %p229_p11 = scmp.lt.s32.totalorder (!%p189_p10), %s594_s15, 1  ;;  %v604_v0 = vmov (!%p189_p10), 0   ;;  %v246_v1 = vld [vmem:[%s746_s2] sm:$0xff] (!%p189_p10)  ;;  %vm265_vm0 = vcmask (!%p189_p10), 1041408   ;;  %vm261_vm1 = vcmask (!%p189_p10), 31744   ;;  %s221_s8 = sand.u32 (!%p189_p10), 1, %s586_s13  }
   0xf   : > { %192 = sbr.rel (%p189_p10) target bundleno = 264 (0x108), region = 32  ;;  %304 = vmatprep.mubr.bf16.mxu0 (!%p189_p10), %v604_v0  ;;  %523 = vset.pattern.permute.xlu0 (!%p189_p10), %v604_v0  ;;  %v244_v5 = vld [vmem:[%s744_s0] sm:$0xf] (!%p189_p10)  ;;  %s454_s9 = sshll.u32 (!%p189_p10), %s221_s8, 4 }
  0x10   : > { %249 = vperm.xlu0 (!%p189_p10), %523, %v246_v1   ;;  %s466_s10 = sshll.u32 (!%p189_p10), %s594_s15, 8  ;;  %s223_s11 = scalar_lea.vmem (!%p189_p10), [#allocation2], %s454_s9 }
  0x11   : > { %s336_s18 = sshll.u32 (!%p189_p10), %s223_s11, 4  ;;  %s697_s23 = scalar_lea.hbm (!%p189_p10), %s747_s3, %s466_s10  ;;  %s699_s18 = int_to_ptr.vmem [resolvable:$true] %s336_s18 }
  0x12   : > { %s524_s26 = scalar_lea.vmem (!%p189_p10), %s699_s18, 256  ;;  %s605_s27 = smov (!%p189_p10), [#allocation2]  }
  0x13   : > { %p525_p12 = scmp.ne.s32.totalorder (!%p189_p10), %s699_s18, %s524_s26 }
  0x15   : > { %p526_p13 = pnand (!%p189_p10), %p525_p12, %p666_p4 }
  0x16   : > { %s230_s28 = scalar_select %p229_p11, %s594_s15, 1 }
  0x17   : > { %s318_s15 = scalar_lea.sflag [#allocation3], %s221_s8  ;;  %p527_p0 = pneg %p526_p13 }
  0x18   : > { %s465_s29 = sshll.u32 %s230_s28, 2  ;;  %s528_s28 = sshll.u32 %s605_s27, 4  ;;  %s529_s28 = int_to_ptr.vmem [resolvable:$false] %s528_s28 }
  0x19   : > { %s236_s5 = scalar_lea.vmem %s745_s1, %s465_s29  ;;  %s530_s29 = scalar_lea.vmem %s529_s28, 512 }
  0x1a   : > { %v457_v2 = vld.sshfl [vmem:[%s236_s5] sm:$0x33 pattern:$0x76325410]  ;;  %p531_p1 = scmp.lt.s32.totalorder %s699_s18, %s529_s28  ;;  %p532_p2 = scmp.lt.s32.totalorder %s530_s29, %s524_s26 }
  0x1b   : > { %v260_v3 = vcombine.high %v457_v2, %v457_v2  ;;  %v267_v4 = vsel %vm265_vm0, %v457_v2, 0 }
  0x1c   : > { %p533_p3 = por %p532_p2, %p531_p1 }
  0x1d   : > { %458 = vmatprep.subr.msk.bf16.mxu0 %vm265_vm0, %v260_v3 }
  0x1e   : > { %273 = vmatpush1.bf16.msra.mxu0 %v267_v4  ;;  %p534_p5 = pnand %p533_p3, %p527_p0 }
  0x21   : > { %459 = vmatmul.mubr.msk.bf16.vlgmr.msra.gmra.mrb[0].mxu0 %vm261_vm1, %v244_v5 }
  0x8f   : > { %v250_v6 = vpop.permute.xlu0 %249 }
  0xf4   : > { %v306_v7 = vpop.f32.mrb[0].mxu0 }
  0xf5   : > { %v307_v8 = vadd.f32 %v306_v7, %v250_v6  ;;  %v308_v9 = vpop.f32.mrb[1].mxu0 }
  0xf6   : > { %v309_v10 = vadd.f32 %v308_v9, %v250_v6  ;;  %v310_v11 = vpop.f32.mrb[2].mxu0 }
  0xf7   : > { %v313_v12 = vmax.f32 %v307_v8, 0.0  ;;  %v311_v13 = vpop.f32.mrb[3].mxu0 }
  0xf8   : > { %v314_v14 = vmax.f32 %v309_v10, 0.0 }
  0xf9   : > { %315 = vst [vmem:[%s223_s11] sm:$0xff] %v313_v12 }
  0xfa   : > { %316 = vst [vmem:[%s223_s11 + $0x8] sm:$0xff] %v314_v14 }
  0xfb   : > { %537 = shalt.err (!%p534_p5)
}
  0xfc   : > { %s538_s30 = scalar_lea.hbm %s697_s23, 256  ;;  %s542_s6 = scalar_lea.hbm %s747_s3, 512 }
  0xfd   : > { %p539_p6 = scmp.ne.s32.totalorder %s697_s23, %s538_s30  ;;  %p543_p10 = scmp.lt.u32.totalorder %s697_s23, %s747_s3 }
  0xfe   : > { %p544_p11 = scmp.lt.u32.totalorder %s542_s6, %s538_s30  ;;  %p546_p13 = scmp.lt.u32.totalorder %s538_s30, %s697_s23 }
  0xff   : > { %p540_p7 = pnand %p539_p6, %p666_p4 }
 0x100   : > { %p545_p12 = por %p544_p11, %p543_p10 }
 0x101   : > { %p541_p9 = pneg %p540_p7 }
 0x102   : > { %p547_p0 = por %p546_p13, %p545_p12 }
 0x104   : > { %p548_p1 = pnand %p547_p0, %p541_p9 }
 0x106   : > { %551 = shalt.err (!%p548_p1)
}
 0x107   : > { %467 = dma.vmem_to_hbm [thread:$0]  (%p666_p4), %s699_s18, 256, %s697_s23, %s318_s15  }
 0x108 PF: > { %p473_p2 = scmp.ge.s32.totalorder %s602_s17, 2  ;;  %s348_s9 = sand.u32 1, %s582_s12  }
 0x109   : > { %s349_s10 = scalar_lea.sflag [#allocation3], %s348_s9 }
 0x10a   : > { %p470_p3 = pnand %p473_p2, %p673_p8 }
 0x10c   : > { %577 = dma.done.wait (!%p470_p3), %s349_s10, 256  }
 0x10d   : > { %579 = vsyncadd (!%p470_p3), %s349_s10, 4294967040  ;;  %s16_s17 = sadd.s32 1, %s602_s17   ;;  %s750_s12 = smov %s586_s13 }
 0x10e   : > { %p13_p5 = scmp.ge.s32.totalorder %s16_s17, 4   ;;  %s751_s13 = smov %s590_s14 }
 0x10f   : > { %s752_s14 = smov %s679_s25  ;;  %s753_s15 = smov %s598_s16 }
 0x110   : > { %s754_s16 = smov %s756_s20  ;;  %15 = sbr.rel (!%p13_p5) target bundleno = 4 (0x4), region = 73 }
 0x117   :  { %354 = vsyncpa [#allocation3], 1 }
 0x118   :  { %356 = vsyncpa [#allocation3 + $0x1], 1 }

</bundles_post_ra>
